<compile_context>
chip_gen: v5e
topology: v5e:2x2
jax: 0.10.0
libtpu: 0.0.40
codegen_flags: <defaults>
</compile_context>

<pallas_src>
import jax
import jax.numpy as jnp
from jax import lax
from jax.experimental import pallas as pl
from jax.experimental.pallas import tpu as pltpu


def _round_up(a: int, b: int) -> int:
    return (a + b - 1) // b * b


def _key_matmul_kernel(x_ref, w_ref, o_ref, acc_ref):
    # x_ref: (TM, TK)   flattened activations tile
    # w_ref: (TN, TK)   weight tile in native PyTorch (dim_attn, dim_input) layout
    # o_ref: (TM, TN)   output tile
    # acc_ref: (TM, TN) f32 accumulator scratch (persists across the K grid axis)
    k = pl.program_id(2)

    @pl.when(k == 0)
    def _():
        acc_ref[...] = jnp.zeros_like(acc_ref)

    # Contract x (.., K) with W (N, K) along K -> (TM, TN). MXU handles transposed RHS natively.
    acc_ref[...] += lax.dot_general(
        x_ref[...],
        w_ref[...],
        dimension_numbers=(((1,), (1,)), ((), ())),
        preferred_element_type=jnp.float32,
    )

    @pl.when(k == pl.num_programs(2) - 1)
    def _():
        o_ref[...] = acc_ref[...].astype(o_ref.dtype)


def key_forward(x, weight):
    """Equivalent of `Key.forward`: y = x @ weight.T (no bias).

    x:      (..., dim_input)
    weight: (dim_attn, dim_input)   -- PyTorch nn.Linear weight layout
    returns (..., dim_attn)
    """
    dim_attn, dim_input = weight.shape
    lead_shape = x.shape[:-1]
    m = 1
    for d in lead_shape:
        m *= d

    x2d = x.reshape(m, dim_input)

    # ---- Tile-size selection (static, from shapes) -------------------------------------
    # M: multiple of 16 (safe for f32 and bf16 sublane packing), up to 512 rows per tile.
    tm = min(512, _round_up(m, 16))
    m_pad = _round_up(m, tm)

    # N: pad to lane-dense multiple of 128; 256-wide tiles when possible (MXU friendly).
    n_pad = _round_up(dim_attn, 128)
    tn = 256 if n_pad % 256 == 0 else 128

    # K: keep the full contraction in one block while it comfortably fits VMEM,
    #    otherwise stream it in 512-wide slabs (f32-accumulated on-chip).
    if dim_input <= 2048:
        tk = dim_input
        k_pad = dim_input
    else:
        tk = 512
        k_pad = _round_up(dim_input, tk)

    # ---- Zero-pad (only when needed) so blocks tile the arrays exactly -----------------
    if (m_pad != m) or (k_pad != dim_input):
        x2d = jnp.pad(x2d, ((0, m_pad - m), (0, k_pad - dim_input)))
    w = weight
    if (n_pad != dim_attn) or (k_pad != dim_input):
        w = jnp.pad(weight, ((0, n_pad - dim_attn), (0, k_pad - dim_input)))

    grid = (m_pad // tm, n_pad // tn, k_pad // tk)

    itemsize = jnp.dtype(x.dtype).itemsize
    cost = pl.CostEstimate(
        flops=2 * m * dim_input * dim_attn,
        transcendentals=0,
        bytes_accessed=(m_pad * k_pad + n_pad * k_pad + m_pad * n_pad) * itemsize,
    )

    out = pl.pallas_call(
        _key_matmul_kernel,
        out_shape=jax.ShapeDtypeStruct((m_pad, n_pad), x.dtype),
        grid_spec=pltpu.PrefetchScalarGridSpec(
            num_scalar_prefetch=0,
            grid=grid,
            in_specs=[
                pl.BlockSpec((tm, tk), lambda i, j, k: (i, k)),  # x tile
                pl.BlockSpec((tn, tk), lambda i, j, k: (j, k)),  # weight tile (native layout)
            ],
            out_specs=pl.BlockSpec((tm, tn), lambda i, j, k: (i, j)),
            scratch_shapes=[pltpu.VMEM((tm, tn), jnp.float32)],
        ),
        compiler_params=pltpu.CompilerParams(
            dimension_semantics=("parallel", "parallel", "arbitrary"),
        ),
        cost_estimate=cost,
    )(x2d, w)

    out = out[:m, :dim_attn]
    return out.reshape(*lead_shape, dim_attn)


if __name__ == "__main__":
    # Small shapes consistent with the module: (batch, seq, dim_input) -> (batch, seq, dim_attn)
    batch, seq, dim_input, dim_attn = 2, 8, 32, 32

    key = jax.random.PRNGKey(0)
    kx, kw = jax.random.split(key)

    x = jax.random.normal(kx, (batch, seq, dim_input), dtype=jnp.float32)
    # Deterministic weight init (PyTorch Linear weight shape: (dim_attn, dim_input)).
    weight = jax.random.normal(kw, (dim_attn, dim_input), dtype=jnp.float32) * (
        1.0 / jnp.sqrt(dim_input)
    )

    y = key_forward(x, weight)
    y = jax.block_until_ready(y)

    # Sanity check against plain-JAX reference.
    y_ref = jnp.einsum("bsi,ai->bsa", x, weight)
    assert y.shape == (batch, seq, dim_attn)
    assert jnp.allclose(y, y_ref, atol=1e-5, rtol=1e-5)

    print("KERNEL_OK")
</pallas_src>

<mosaic_0001>
module attributes {stable_mosaic.version = 11 : i64} {
  func.func @_key_matmul_kernel(%arg0: i32, %arg1: i32, %arg2: i32, %arg3: memref<16x32xf32, #tpu.memory_space<vmem>>, %arg4: memref<128x32xf32, #tpu.memory_space<vmem>>, %arg5: memref<16x128xf32, #tpu.memory_space<vmem>>, %arg6: memref<16x128xf32, #tpu.memory_space<vmem>>) attributes {dimension_semantics = [#tpu.dimension_semantics<parallel>, #tpu.dimension_semantics<parallel>, #tpu.dimension_semantics<arbitrary>], iteration_bounds = array<i64: 1, 1, 1>, scalar_prefetch = 0 : i64, scratch_operands = 1 : i64, tpu.core_type = #tpu.core_type<tc>, window_params = [{transform_indices = @transform_0, window_bounds = array<i64: 16, 32>}, {transform_indices = @transform_1, window_bounds = array<i64: 128, 32>}, {transform_indices = @transform_2, window_bounds = array<i64: 16, 128>}]} {
    %c0_i32 = arith.constant 0 : i32
    %0 = arith.cmpi eq, %arg2, %c0_i32 : i32
    %1 = arith.extui %0 : i1 to i32
    %c0_i32_0 = arith.constant 0 : i32
    %2 = arith.cmpi ne, %1, %c0_i32_0 : i32
    scf.if %2 {
      %cst_10 = arith.constant 0.000000e+00 : f32
      %12 = vector.broadcast %cst_10 : f32 to vector<16x128xf32>
      %c0_11 = arith.constant 0 : index
      %c0_12 = arith.constant 0 : index
      %13 = vector.load %arg6[%c0_11, %c0_12] : memref<16x128xf32, #tpu.memory_space<vmem>>, vector<16x128xf32>
      tpu.vector_store %arg6[%c0_11, %c0_12], %12 {strides = array<i32>} : memref<16x128xf32, #tpu.memory_space<vmem>>, vector<16x128xf32>,
    } else {
    }
    %c0 = arith.constant 0 : index
    %c0_1 = arith.constant 0 : index
    %3 = vector.load %arg6[%c0, %c0_1] : memref<16x128xf32, #tpu.memory_space<vmem>>, vector<16x128xf32>
    %c0_2 = arith.constant 0 : index
    %c0_3 = arith.constant 0 : index
    %4 = vector.load %arg3[%c0_2, %c0_3] : memref<16x32xf32, #tpu.memory_space<vmem>>, vector<16x32xf32>
    %c0_4 = arith.constant 0 : index
    %c0_5 = arith.constant 0 : index
    %5 = vector.load %arg4[%c0_4, %c0_5] : memref<128x32xf32, #tpu.memory_space<vmem>>, vector<128x32xf32>
    %cst = arith.constant dense<0.000000e+00> : vector<16x128xf32>
    %6 = tpu.matmul %4, %5, %cst {dimension_numbers = #tpu.dot_dimension_numbers<[1], [1], [0], [0], [0, 0, 1, 0], [], []>} : vector<16x32xf32>, vector<128x32xf32>, vector<16x128xf32> -> vector<16x128xf32>
    %7 = arith.addf %3, %6 : vector<16x128xf32>
    %c0_6 = arith.constant 0 : index
    %c0_7 = arith.constant 0 : index
    %8 = vector.load %arg6[%c0_6, %c0_7] : memref<16x128xf32, #tpu.memory_space<vmem>>, vector<16x128xf32>
    tpu.vector_store %arg6[%c0_6, %c0_7], %7 {strides = array<i32>} : memref<16x128xf32, #tpu.memory_space<vmem>>, vector<16x128xf32>,
    %c0_i32_8 = arith.constant 0 : i32
    %9 = arith.cmpi eq, %arg2, %c0_i32_8 : i32
    %10 = arith.extui %9 : i1 to i32
    %c0_i32_9 = arith.constant 0 : i32
    %11 = arith.cmpi ne, %10, %c0_i32_9 : i32
    scf.if %11 {
      %c0_10 = arith.constant 0 : index
      %c0_11 = arith.constant 0 : index
      %12 = vector.load %arg6[%c0_10, %c0_11] : memref<16x128xf32, #tpu.memory_space<vmem>>, vector<16x128xf32>
      %c0_12 = arith.constant 0 : index
      %c0_13 = arith.constant 0 : index
      %13 = vector.load %arg5[%c0_12, %c0_13] : memref<16x128xf32, #tpu.memory_space<vmem>>, vector<16x128xf32>
      tpu.vector_store %arg5[%c0_12, %c0_13], %12 {strides = array<i32>} : memref<16x128xf32, #tpu.memory_space<vmem>>, vector<16x128xf32>,
    } else {
    }
    return
  }
  func.func @transform_0(%arg0: i32, %arg1: i32, %arg2: i32) -> (i32, i32) {
    %c0_i32 = arith.constant 0 : i32
    return %arg0, %arg2 : i32, i32
  }
  func.func @transform_1(%arg0: i32, %arg1: i32, %arg2: i32) -> (i32, i32) {
    %c0_i32 = arith.constant 0 : i32
    return %arg1, %arg2 : i32, i32
  }
  func.func @transform_2(%arg0: i32, %arg1: i32, %arg2: i32) -> (i32, i32) {
    %c0_i32 = arith.constant 0 : i32
    return %arg0, %arg1 : i32, i32
  }
}

</mosaic_0001>

<bundles_post_ra>
// kernel: tpu_custom_call.1
= control target key start
LH: loop header
LB: loop body
LE: loop exit
PB: predicated region body
PF: predicated region fallthrough
CT: control target
= control target key end

     0   :  { %vm38_vm0 = vcmask 261120   ;;  %s317_s0 = inlined_call_operand.vmem [shape: f32[16,32], index: 0, kind: input, shape index: {}]   ;;  %s318_s1 = inlined_call_operand.vmem [shape: f32[128,32], index: 1, kind: input, shape index: {}]   ;;  %s319_s2 = inlined_call_operand.hbm [shape: f32[16,128], index: 2, kind: output, shape index: {}]  }
   0x1   :  { %v37_v0 = vld [vmem:[%s318_s1 + $0x78] sm:$0xff]  ;;  %v36_v1 = vld [vmem:[%s318_s1 + $0x70] sm:$0xff] }
   0x2   :  { %145 = vmatpush.xpose.msk.msra.mxu0 %vm38_vm0, %v37_v0  ;;  %163 = vmatpush.xpose.msk.msra.mxu1 %vm38_vm0, %v37_v0 }
   0x3   :  { %7 = vsyncpa [#allocation4], 0  ;;  %v35_v2 = vld [vmem:[%s318_s1 + $0x68] sm:$0xff]  ;;  %v34_v3 = vld [vmem:[%s318_s1 + $0x60] sm:$0xff]  ;;  %s208_s17 = smov [#allocation3]   ;;  %s133_s20 = sshll.u32 %s319_s2, 4  ;;  %s134_s20 = int_to_ptr.hbm [resolvable:$true] %s133_s20 }
   0x4   :  { %v33_v4 = vld [vmem:[%s318_s1 + $0x58] sm:$0xff]  ;;  %v32_v5 = vld [vmem:[%s318_s1 + $0x50] sm:$0xff]  ;;  %v31_v6 = vld [vmem:[%s318_s1 + $0x48] sm:$0xff]  ;;  %s131_s18 = sshll.u32 %s208_s17, 4  ;;  %s209_s21 = smov 128   ;;  %s132_s18 = int_to_ptr.vmem [resolvable:$true] %s131_s18 }
   0x5   :  { %v30_v7 = vld [vmem:[%s318_s1 + $0x40] sm:$0xff]  ;;  %v29_v8 = vld [vmem:[%s318_s1 + $0x38] sm:$0xff]  ;;  %v28_v9 = vld [vmem:[%s318_s1 + $0x30] sm:$0xff]  ;;  %s210_s22 = smov 8  }
   0x6   :  { %146 = vmatpush.xpose.msk.msra.mxu0 %vm38_vm0, %v36_v1  ;;  %164 = vmatpush.xpose.msk.msra.mxu1 %vm38_vm0, %v36_v1  ;;  %v27_v10 = vld [vmem:[%s318_s1 + $0x28] sm:$0xff]  ;;  %v26_v11 = vld [vmem:[%s318_s1 + $0x20] sm:$0xff]  ;;  %v25_v12 = vld [vmem:[%s318_s1 + $0x18] sm:$0xff] }
   0x7   :  { %v24_v13 = vld [vmem:[%s318_s1 + $0x10] sm:$0xff]  ;;  %v23_v14 = vld [vmem:[%s318_s1 + $0x8] sm:$0xff]  ;;  %v22_v15 = vld [vmem:[%s318_s1] sm:$0xff] }
   0x8   :  { %v20_v16 = vld [vmem:[%s317_s0] sm:$0xff]  ;;  %v21_v17 = vld [vmem:[%s317_s0 + $0x8] sm:$0xff] }
   0xa   :  { %147 = vmatpush.xpose.msk.msra.mxu0 %vm38_vm0, %v35_v2  ;;  %165 = vmatpush.xpose.msk.msra.mxu1 %vm38_vm0, %v35_v2 }
   0xe   :  { %148 = vmatpush.xpose.msk.msra.mxu0 %vm38_vm0, %v34_v3  ;;  %166 = vmatpush.xpose.msk.msra.mxu1 %vm38_vm0, %v34_v3 }
  0x12   :  { %149 = vmatpush.xpose.msk.msra.mxu0 %vm38_vm0, %v33_v4  ;;  %167 = vmatpush.xpose.msk.msra.mxu1 %vm38_vm0, %v33_v4 }
  0x16   :  { %150 = vmatpush.xpose.msk.msra.mxu0 %vm38_vm0, %v32_v5  ;;  %168 = vmatpush.xpose.msk.msra.mxu1 %vm38_vm0, %v32_v5 }
  0x1a   :  { %151 = vmatpush.xpose.msk.msra.mxu0 %vm38_vm0, %v31_v6  ;;  %169 = vmatpush.xpose.msk.msra.mxu1 %vm38_vm0, %v31_v6 }
  0x1e   :  { %152 = vmatpush.xpose.msk.msra.mxu0 %vm38_vm0, %v30_v7  ;;  %170 = vmatpush.xpose.msk.msra.mxu1 %vm38_vm0, %v30_v7 }
  0x22   :  { %153 = vmatpush.xpose.msk.msra.mxu0 %vm38_vm0, %v29_v8  ;;  %171 = vmatpush.xpose.msk.msra.mxu1 %vm38_vm0, %v29_v8 }
  0x26   :  { %154 = vmatpush.xpose.msk.msra.mxu0 %vm38_vm0, %v28_v9  ;;  %172 = vmatpush.xpose.msk.msra.mxu1 %vm38_vm0, %v28_v9 }
  0x2a   :  { %155 = vmatpush.xpose.msk.msra.mxu0 %vm38_vm0, %v27_v10  ;;  %173 = vmatpush.xpose.msk.msra.mxu1 %vm38_vm0, %v27_v10 }
  0x2e   :  { %156 = vmatpush.xpose.msk.msra.mxu0 %vm38_vm0, %v26_v11  ;;  %174 = vmatpush.xpose.msk.msra.mxu1 %vm38_vm0, %v26_v11 }
  0x32   :  { %157 = vmatpush.xpose.msk.msra.mxu0 %vm38_vm0, %v25_v12  ;;  %175 = vmatpush.xpose.msk.msra.mxu1 %vm38_vm0, %v25_v12 }
  0x36   :  { %158 = vmatpush.xpose.msk.msra.mxu0 %vm38_vm0, %v24_v13  ;;  %176 = vmatpush.xpose.msk.msra.mxu1 %vm38_vm0, %v24_v13 }
  0x3a   :  { %159 = vmatpush.xpose.msk.msra.mxu0 %vm38_vm0, %v23_v14  ;;  %177 = vmatpush.xpose.msk.msra.mxu1 %vm38_vm0, %v23_v14 }
  0x3e   :  { %160 = vmatpush.xpose.msk.msra.mxu0 %vm38_vm0, %v22_v15  ;;  %178 = vmatpush.xpose.msk.msra.mxu1 %vm38_vm0, %v22_v15 }
  0x41   :  { %161 = vmatmul.msk.f32.vlgmr.msra.gmra.mxu0 %vm38_vm0, %v20_v16  ;;  %162 = vmatmul.msk.f32.vlgmr.msra.gmra.mxu1 %vm38_vm0, %v21_v17 }
  0xbe   :  { %v110_v18 = vpop.f32.mrf.mxu0  ;;  %v113_v19 = vpop.f32.mrf.mxu1 }
  0xbf   :  { %125 = vst [vmem:[#allocation3] sm:$0xff] %v110_v18 }
  0xc0   :  { %126 = vst [vmem:[#allocation3 + $0x8] sm:$0xff] %v113_v19 }
  0xc1   :  { %139 = dma.vmem_to_hbm [thread:$0]  %s132_s18, 256, %s134_s20, [#allocation4], %s209_s21, %s209_s21, %s210_s22  }
  0xc2   :  { %206 = dma.done.wait [#allocation4], 256  }
  0xc3   :  { %207 = vsyncadd [#allocation4], 4294967040 }
  0xc4   :  { %144 = vsyncpa [#allocation4], 1 }

</bundles_post_ra>
